<compile_context>
chip_gen: v7x
topology: tpu7x:2x2x1
jax: 0.10.0
libtpu: 0.0.40
codegen_flags: <defaults>
</compile_context>

<pallas_src>
import jax
import jax.numpy as jnp
from jax.experimental import pallas as pl
from jax.experimental.pallas import tpu as pltpu

_NEG_SLOPE = 0.01  # torch.nn.LeakyReLU default
_LANE = 128


def _round_up(n, m):
    return ((n + m - 1) // m) * m


def _leaky_relu(x):
    # Valid only because the slope is in (0, 1): max(x, a*x) == where(x>0, x, a*x).
    return jnp.maximum(x, _NEG_SLOPE * x)


def mlp_reg_kernel(x_ref, w1_ref, b1_ref, w2_ref, b2_ref, w3t_ref, b3_ref, o_ref):
    cdt = w1_ref.dtype  # MXU operand dtype (bf16); accumulation is always f32

    x = x_ref[...].astype(cdt)  # single in-kernel cast (VPU filler, HBM stays f32)

    h1 = jnp.dot(x, w1_ref[...], preferred_element_type=jnp.float32) + b1_ref[...]
    h1 = _leaky_relu(h1)  # f32 elementwise (v5e-safe)

    h2 = jnp.dot(h1.astype(cdt), w2_ref[...], preferred_element_type=jnp.float32) + b2_ref[...]
    h2 = _leaky_relu(h2).astype(cdt)  # (tile_b, Hp) bf16

    # Final layer emits the transposed row directly: (1, Hp) x (tile_b, Hp) -> (1, tile_b).
    out = jnp.einsum("oh,bh->ob", w3t_ref[...], h2,
                     preferred_element_type=jnp.float32) + b3_ref[...]
    o_ref[...] = out.astype(o_ref.dtype)  # lane-dense (1, tile_b) store


def _choose_tile_b(B):
    """Batch tile: single tile for small B; otherwise a 128-multiple sized so the
    grid has >= 2 steps (v7x megacore) and at most 1024 rows per step."""
    cap = 1024
    if B <= 2 * _LANE:
        return B  # one tile, no padding needed; blocks equal full array dims
    return min(_round_up(pl.cdiv(B, 2), _LANE), cap)


def pad_params(params, compute_dtype=jnp.bfloat16):
    """One-time (out of the hot path) padding + bf16 cast of the weights.

    params: w1 (D,H), b1 (H,), w2 (H,H), b2 (H,), w3 (H,1), b3 (1,)
    Only H is padded (to a 128-lane multiple); D stays unpadded. Zero padding is
    exact through matmul + bias + LeakyReLU.
    """
    w1, b1 = params["w1"], params["b1"]
    w2, b2 = params["w2"], params["b2"]
    w3, b3 = params["w3"], params["b3"]
    D, H = w1.shape
    assert w2.shape == (H, H) and w3.shape == (H, 1)
    Hp = _round_up(H, _LANE)

    w1p = jnp.zeros((D, Hp), compute_dtype).at[:, :H].set(w1.astype(compute_dtype))
    w2p = jnp.zeros((Hp, Hp), compute_dtype).at[:H, :H].set(w2.astype(compute_dtype))
    w3t = jnp.zeros((1, Hp), compute_dtype).at[0, :H].set(w3[:, 0].astype(compute_dtype))
    b1p = jnp.zeros((1, Hp), jnp.float32).at[0, :H].set(b1.astype(jnp.float32))
    b2p = jnp.zeros((1, Hp), jnp.float32).at[0, :H].set(b2.astype(jnp.float32))
    b3p = b3.astype(jnp.float32).reshape(1, 1)
    return {"w1": w1p, "b1": b1p, "w2": w2p, "b2": b2p, "w3t": w3t, "b3": b3p}


def mlp_reg_forward(x, padded_params):
    """Forward pass of MLP_reg. x: (B, D) float. Returns torch-style x.squeeze():
    shape (B,) or a scalar when B == 1."""
    w1, b1 = padded_params["w1"], padded_params["b1"]
    w2, b2 = padded_params["w2"], padded_params["b2"]
    w3t, b3 = padded_params["w3t"], padded_params["b3"]

    B, D = x.shape
    assert w1.shape[0] == D, (w1.shape, D)
    Hp = w1.shape[1]

    tile_b = _choose_tile_b(B)
    grid = (pl.cdiv(B, tile_b),)

    # VMEM budget: double-buffered resident weights + pipelined x/out tiles +
    # live f32 intermediates; clamp to [32 MiB, 64 MiB].
    w_itemsize = jnp.dtype(w1.dtype).itemsize
    w_bytes = (w1.size + w2.size + w3t.size) * w_itemsize + (b1.size + b2.size + b3.size) * 4
    io_bytes = 2 * (tile_b * D * x.dtype.itemsize + tile_b * 4)
    live_bytes = 3 * tile_b * Hp * 4
    vmem_limit = int(min(max((2 * w_bytes + io_bytes + live_bytes) * 2, 32 << 20), 64 << 20))

    def resident(shape):
        # Constant index_map: block never changes across the grid -> stays in VMEM.
        return pl.BlockSpec(shape, lambda i: (0, 0))

    out = pl.pallas_call(
        mlp_reg_kernel,
        out_shape=jax.ShapeDtypeStruct((1, B), jnp.float32),
        grid=grid,
        in_specs=[
            pl.BlockSpec((tile_b, D), lambda i: (i, 0)),  # x: unpadded, batch-pipelined
            resident((D, Hp)),                            # w1
            resident((1, Hp)),                            # b1
            resident((Hp, Hp)),                           # w2
            resident((1, Hp)),                            # b2
            resident((1, Hp)),                            # w3^T row
            resident((1, 1)),                             # b3
        ],
        out_specs=pl.BlockSpec((1, tile_b), lambda i: (0, i)),  # lane-dense (1, B) output
        compiler_params=pltpu.CompilerParams(
            dimension_semantics=("parallel",),  # megacore sharding of the batch axis
            vmem_limit_bytes=vmem_limit,
        ),
    )(x, w1, b1, w2, b2, w3t, b3)

    # torch's x.squeeze(): (B,) for B > 1, scalar for B == 1.
    return jnp.squeeze(out)


def init_params(key, input_size, hidden_size):
    """PyTorch-style uniform(-1/sqrt(fan_in), 1/sqrt(fan_in)) init."""
    keys = jax.random.split(key, 6)

    def lin(kw, kb, fan_in, fan_out):
        bound = 1.0 / jnp.sqrt(jnp.float32(fan_in))
        w = jax.random.uniform(kw, (fan_in, fan_out), jnp.float32, -bound, bound)
        b = jax.random.uniform(kb, (fan_out,), jnp.float32, -bound, bound)
        return w, b

    w1, b1 = lin(keys[0], keys[1], input_size, hidden_size)
    w2, b2 = lin(keys[2], keys[3], hidden_size, hidden_size)
    w3, b3 = lin(keys[4], keys[5], hidden_size, 1)
    return {"w1": w1, "b1": b1, "w2": w2, "b2": b2, "w3": w3, "b3": b3}


def _reference(x, p, *, compute_dtype=jnp.float32):
    """Pure-JAX reference. compute_dtype=bf16 mirrors the kernel's MXU operand
    rounding (f32 accumulation, f32 activation math); f32 is the exact module."""
    cdt = compute_dtype

    def dot(a, b):
        return jnp.dot(a.astype(cdt), b.astype(cdt), preferred_element_type=jnp.float32)

    h = dot(x.astype(jnp.float32), p["w1"]) + p["b1"].astype(jnp.float32)
    h = jnp.where(h > 0, h, _NEG_SLOPE * h)
    h = dot(h, p["w2"]) + p["b2"].astype(jnp.float32)
    h = jnp.where(h > 0, h, _NEG_SLOPE * h)
    out = dot(h, p["w3"]) + p["b3"].astype(jnp.float32)
    return jnp.squeeze(out)


if __name__ == "__main__":
    key = jax.random.PRNGKey(0)
    k_param, k_x1, k_x2 = jax.random.split(key, 3)

    input_size, hidden_size = 16, 32
    params = init_params(k_param, input_size, hidden_size)
    pparams = pad_params(params)  # hoisted out of the per-call hot path

    fwd = jax.jit(mlp_reg_forward)

    # --- small batch (toy spec size): single tile, grid=(1,) ---
    x_small = jax.random.normal(k_x1, (8, input_size), dtype=jnp.float32)
    y = jax.block_until_ready(fwd(x_small, pparams))
    assert y.shape == (8,), y.shape

    y_bf16_ref = _reference(x_small, params, compute_dtype=jnp.bfloat16)
    y_f32_ref = _reference(x_small, params, compute_dtype=jnp.float32)
    # Tolerance check vs. the bf16-operand reference (same numerics as the kernel).
    assert jnp.allclose(y, y_bf16_ref, atol=1e-3, rtol=1e-3), "mismatch vs bf16 reference"
    # Loose check vs. the pure-f32 module (bf16 operand rounding ~1e-2 relative).
    assert jnp.allclose(y, y_f32_ref, atol=5e-2, rtol=5e-2), "mismatch vs f32 reference"

    # --- larger, non-multiple-of-tile batch: exercises grid>=2 + masked last block ---
    x_big = jax.random.normal(k_x2, (1030, input_size), dtype=jnp.float32)
    y_big = jax.block_until_ready(fwd(x_big, pparams))
    assert y_big.shape == (1030,), y_big.shape
    yb_ref = _reference(x_big, params, compute_dtype=jnp.bfloat16)
    assert jnp.allclose(y_big, yb_ref, atol=1e-3, rtol=1e-3), "mismatch vs bf16 reference (big)"

    print("KERNEL_OK")
</pallas_src>

<mosaic_0001>
module attributes {stable_mosaic.version = 11 : i64} {
  func.func @mlp_reg_kernel(%arg0: i32, %arg1: memref<8x16xf32, #tpu.memory_space<vmem>>, %arg2: memref<16x128xbf16, #tpu.memory_space<vmem>>, %arg3: memref<1x128xf32, #tpu.memory_space<vmem>>, %arg4: memref<128x128xbf16, #tpu.memory_space<vmem>>, %arg5: memref<1x128xf32, #tpu.memory_space<vmem>>, %arg6: memref<1x128xbf16, #tpu.memory_space<vmem>>, %arg7: memref<1x1xf32, #tpu.memory_space<vmem>>, %arg8: memref<1x8xf32, #tpu.memory_space<vmem>>) attributes {dimension_semantics = [#tpu.dimension_semantics<parallel>], iteration_bounds = array<i64: 1>, scalar_prefetch = 0 : i64, scratch_operands = 0 : i64, tpu.core_type = #tpu.core_type<tc>, window_params = [{transform_indices = @transform_0, window_bounds = array<i64: 8, 16>}, {pipeline_mode = #tpu.pipeline_mode<synchronous>, transform_indices = @transform_1, window_bounds = array<i64: 16, 128>}, {pipeline_mode = #tpu.pipeline_mode<synchronous>, transform_indices = @transform_2, window_bounds = array<i64: 1, 128>}, {pipeline_mode = #tpu.pipeline_mode<synchronous>, transform_indices = @transform_3, window_bounds = array<i64: 128, 128>}, {pipeline_mode = #tpu.pipeline_mode<synchronous>, transform_indices = @transform_4, window_bounds = array<i64: 1, 128>}, {pipeline_mode = #tpu.pipeline_mode<synchronous>, transform_indices = @transform_5, window_bounds = array<i64: 1, 128>}, {pipeline_mode = #tpu.pipeline_mode<synchronous>, transform_indices = @transform_6, window_bounds = array<i64: 1, 1>}, {transform_indices = @transform_7, window_bounds = array<i64: 1, 8>}]} {
    %c0 = arith.constant 0 : index
    %c0_0 = arith.constant 0 : index
    %0 = vector.load %arg1[%c0, %c0_0] : memref<8x16xf32, #tpu.memory_space<vmem>>, vector<8x16xf32>
    %1 = arith.truncf %0 : vector<8x16xf32> to vector<8x16xbf16>
    %c0_1 = arith.constant 0 : index
    %c0_2 = arith.constant 0 : index
    %2 = vector.load %arg2[%c0_1, %c0_2] : memref<16x128xbf16, #tpu.memory_space<vmem>>, vector<16x128xbf16>
    %cst = arith.constant dense<0.000000e+00> : vector<8x128xf32>
    %3 = tpu.matmul %1, %2, %cst {dimension_numbers = #tpu.dot_dimension_numbers<[1], [0], [0], [1], [0, 0, 1, 1], [], []>} : vector<8x16xbf16>, vector<16x128xbf16>, vector<8x128xf32> -> vector<8x128xf32>
    %c0_3 = arith.constant 0 : index
    %c0_4 = arith.constant 0 : index
    %4 = vector.load %arg3[%c0_3, %c0_4] : memref<1x128xf32, #tpu.memory_space<vmem>>, vector<1x128xf32>
    %5 = vector.broadcast %4 : vector<1x128xf32> to vector<8x128xf32>
    %6 = arith.addf %3, %5 : vector<8x128xf32>
    %cst_5 = arith.constant 0.00999999977 : f32
    %7 = vector.broadcast %cst_5 : f32 to vector<8x128xf32>
    %8 = arith.mulf %7, %6 : vector<8x128xf32>
    %9 = arith.maximumf %6, %8 : vector<8x128xf32>
    %10 = arith.truncf %9 : vector<8x128xf32> to vector<8x128xbf16>
    %c0_6 = arith.constant 0 : index
    %c0_7 = arith.constant 0 : index
    %11 = vector.load %arg4[%c0_6, %c0_7] : memref<128x128xbf16, #tpu.memory_space<vmem>>, vector<128x128xbf16>
    %cst_8 = arith.constant dense<0.000000e+00> : vector<8x128xf32>
    %12 = tpu.matmul %10, %11, %cst_8 {dimension_numbers = #tpu.dot_dimension_numbers<[1], [0], [0], [1], [0, 0, 1, 1], [], []>} : vector<8x128xbf16>, vector<128x128xbf16>, vector<8x128xf32> -> vector<8x128xf32>
    %c0_9 = arith.constant 0 : index
    %c0_10 = arith.constant 0 : index
    %13 = vector.load %arg5[%c0_9, %c0_10] : memref<1x128xf32, #tpu.memory_space<vmem>>, vector<1x128xf32>
    %14 = vector.broadcast %13 : vector<1x128xf32> to vector<8x128xf32>
    %15 = arith.addf %12, %14 : vector<8x128xf32>
    %cst_11 = arith.constant 0.00999999977 : f32
    %16 = vector.broadcast %cst_11 : f32 to vector<8x128xf32>
    %17 = arith.mulf %16, %15 : vector<8x128xf32>
    %18 = arith.maximumf %15, %17 : vector<8x128xf32>
    %19 = arith.truncf %18 : vector<8x128xf32> to vector<8x128xbf16>
    %c0_12 = arith.constant 0 : index
    %c0_13 = arith.constant 0 : index
    %20 = vector.load %arg6[%c0_12, %c0_13] : memref<1x128xbf16, #tpu.memory_space<vmem>>, vector<1x128xbf16>
    "tpu.trace_start"() <{level = 10 : i32, message = "oh,bh->ob"}> : () -> ()
    %cst_14 = arith.constant dense<0.000000e+00> : vector<1x8xf32>
    %21 = tpu.matmul %20, %19, %cst_14 {dimension_numbers = #tpu.dot_dimension_numbers<[1], [1], [0], [0], [0, 0, 1, 0], [], []>} : vector<1x128xbf16>, vector<8x128xbf16>, vector<1x8xf32> -> vector<1x8xf32>
    "tpu.trace_stop"() : () -> ()
    %c0_15 = arith.constant 0 : index
    %c0_16 = arith.constant 0 : index
    %22 = vector.load %arg7[%c0_15, %c0_16] : memref<1x1xf32, #tpu.memory_space<vmem>>, vector<1x1xf32>
    %23 = vector.broadcast %22 : vector<1x1xf32> to vector<1x8xf32>
    %24 = arith.addf %21, %23 : vector<1x8xf32>
    %c0_17 = arith.constant 0 : index
    %c0_18 = arith.constant 0 : index
    %25 = vector.load %arg8[%c0_17, %c0_18] : memref<1x8xf32, #tpu.memory_space<vmem>>, vector<1x8xf32>
    tpu.vector_store %arg8[%c0_17, %c0_18], %24 {strides = array<i32>} : memref<1x8xf32, #tpu.memory_space<vmem>>, vector<1x8xf32>,
    return
  }
  func.func @transform_0(%arg0: i32) -> (i32, i32) {
    %c0_i32 = arith.constant 0 : i32
    %c0_i32_0 = arith.constant 0 : i32
    return %arg0, %c0_i32 : i32, i32
  }
  func.func @transform_1(%arg0: i32) -> (i32, i32) {
    %c0_i32 = arith.constant 0 : i32
    %c0_i32_0 = arith.constant 0 : i32
    %c0_i32_1 = arith.constant 0 : i32
    return %c0_i32, %c0_i32_0 : i32, i32
  }
  func.func @transform_2(%arg0: i32) -> (i32, i32) {
    %c0_i32 = arith.constant 0 : i32
    %c0_i32_0 = arith.constant 0 : i32
    %c0_i32_1 = arith.constant 0 : i32
    return %c0_i32, %c0_i32_0 : i32, i32
  }
  func.func @transform_3(%arg0: i32) -> (i32, i32) {
    %c0_i32 = arith.constant 0 : i32
    %c0_i32_0 = arith.constant 0 : i32
    %c0_i32_1 = arith.constant 0 : i32
    return %c0_i32, %c0_i32_0 : i32, i32
  }
  func.func @transform_4(%arg0: i32) -> (i32, i32) {
    %c0_i32 = arith.constant 0 : i32
    %c0_i32_0 = arith.constant 0 : i32
    %c0_i32_1 = arith.constant 0 : i32
    return %c0_i32, %c0_i32_0 : i32, i32
  }
  func.func @transform_5(%arg0: i32) -> (i32, i32) {
    %c0_i32 = arith.constant 0 : i32
    %c0_i32_0 = arith.constant 0 : i32
    %c0_i32_1 = arith.constant 0 : i32
    return %c0_i32, %c0_i32_0 : i32, i32
  }
  func.func @transform_6(%arg0: i32) -> (i32, i32) {
    %c0_i32 = arith.constant 0 : i32
    %c0_i32_0 = arith.constant 0 : i32
    %c0_i32_1 = arith.constant 0 : i32
    return %c0_i32, %c0_i32_0 : i32, i32
  }
  func.func @transform_7(%arg0: i32) -> (i32, i32) {
    %c0_i32 = arith.constant 0 : i32
    %c0_i32_0 = arith.constant 0 : i32
    return %c0_i32, %arg0 : i32, i32
  }
}

</mosaic_0001>

<bundles_post_ra>
// kernel: mlp_reg_forward.1
= control target key start
LH: loop header
LB: loop body
LE: loop exit
PB: predicated region body
PF: predicated region fallthrough
CT: control target
= control target key end

     0   :  { %s556_s0 = inlined_call_operand.hbm [shape: f32[8,16], index: 0, kind: input, shape index: {}]   ;;  %s557_s1 = inlined_call_operand.vmem [shape: bf16[16,128], index: 1, kind: input, shape index: {}]   ;;  %s558_s2 = inlined_call_operand.vmem [shape: f32[1,128], index: 2, kind: input, shape index: {}]   ;;  %s559_s3 = inlined_call_operand.hbm [shape: bf16[128,128], index: 3, kind: input, shape index: {}]   ;;  %s560_s4 = inlined_call_operand.vmem [shape: f32[1,128], index: 4, kind: input, shape index: {}]   ;;  %s561_s5 = inlined_call_operand.vmem [shape: bf16[1,128], index: 5, kind: input, shape index: {}]   ;;  %s562_s6 = inlined_call_operand.<no memory space> [shape: f32[1,1], index: 6, kind: input, shape index: {}]   ;;  %s563_s7 = inlined_call_operand.hbm [shape: f32[1,8], index: 7, kind: output, shape index: {}]  }
   0x1   :  { %v12_v0 = vstv %s562_s6 }
   0x2   :  { %13 = vst [vmem:[#allocation2] sm:$0x1] %v12_v0 }
   0x3   :  { %14 = vsyncpa [#allocation4], 0 }
   0x4   :  { %15 = vsyncpa [#allocation7], 0 }
   0x5   :  { %16 = vsyncpa [#allocation5], 0  ;;  %s450_s26 = smov [#allocation3]   ;;  %s451_s28 = smov [#allocation6]  }
   0x6   :  { %s23_s27 = sshll.u32 %s450_s26, 4  ;;  %s36_s29 = sshll.u32 %s451_s28, 4  ;;  %s24_s27 = int_to_ptr.vmem [resolvable:$true] %s23_s27  ;;  %s501_s29 = int_to_ptr.vmem [resolvable:$true] %s36_s29 }
   0x7   :  { %s378_s9 = scalar_lea.hbm %s556_s0, 128 }
   0x8   :  { %p379_p0 = scmp.ne.s32.totalorder %s556_s0, %s378_s9  ;;  %p382_p1 = scmp.lt.u32.totalorder %s378_s9, %s556_s0 }
   0xa   :  { %p384_p2 = pnand %p382_p1, %p379_p0 }
   0xc   :  { %387 = shalt.err (!%p384_p2)
}
   0xd   :  { %s388_s13 = scalar_lea.vmem %s24_s27, 128  ;;  %p393_p4 = scmp.lt.s32.totalorder %s24_s27, %s24_s27 }
   0xe   :  { %p389_p3 = scmp.ne.s32.totalorder %s24_s27, %s388_s13  ;;  %p394_p5 = scmp.lt.s32.totalorder %s388_s13, %s388_s13 }
  0x10   :  { %p395_p6 = por %p394_p5, %p393_p4 }
  0x12   :  { %p396_p7 = pnand %p395_p6, %p389_p3 }
  0x14   :  { %399 = shalt.err (!%p396_p7)
}
  0x15   :  { %26 = dma.hbm_to_vmem [thread:$0]  %s556_s0, 128, %s24_s27, [#allocation4]  }
  0x16   :  { %s400_s18 = scalar_lea.hbm %s559_s3, 1024 }
  0x17   :  { %p401_p8 = scmp.ne.s32.totalorder %s559_s3, %s400_s18  ;;  %p404_p9 = scmp.lt.u32.totalorder %s400_s18, %s559_s3 }
  0x19   :  { %p406_p10 = pnand %p404_p9, %p401_p8 }
  0x1b   :  { %409 = shalt.err (!%p406_p10)
}
  0x1c   :  { %s410_s23 = scalar_lea.vmem %s501_s29, 1024  ;;  %p415_p12 = scmp.lt.s32.totalorder %s501_s29, %s501_s29 }
  0x1d   :  { %p411_p11 = scmp.ne.s32.totalorder %s501_s29, %s410_s23  ;;  %p416_p13 = scmp.lt.s32.totalorder %s410_s23, %s410_s23 }
  0x1f   :  { %p417_p0 = por %p416_p13, %p415_p12 }
  0x21   :  { %p418_p1 = pnand %p417_p0, %p411_p11 }
  0x23   :  { %421 = shalt.err (!%p418_p1)
}
  0x24   :  { %s452_s0 = smov 64   ;;  %s453_s24 = smov 4  }
  0x25   :  { %42 = dma.hbm_to_vmem [thread:$0]  %s559_s3, 1024, %s501_s29, [#allocation7], %s452_s0, %s452_s0, %s453_s24  }
  0x26   :  { %444 = dma.done.wait [#allocation4], 128  }
  0x27   :  { %445 = vsyncadd [#allocation4], 4294967168 }
  0x28   :  { %446 = dma.done.wait [#allocation7], 1024  }
  0x29   :  { %447 = vsyncadd [#allocation7], 4294966272  ;;  %v454_v1 = vmov 0.0   ;;  %vm455_vm0 = vmmov 0   ;;  %v369_v2 = vld [vmem:[%s557_s1] sm:$0xff]   ;;  %vm73_vm1 = vcmask 130048   ;;  %v241_v34 = vlaneseq }
  0x2a   :  { %328 = vmatprep.subr.bf16.mxu0 %v454_v1  ;;  %330 = vmatprep.mubr.msk.bf16.mxu0 %vm455_vm0, %v454_v1  ;;  %v56_v3 = vld [vmem:[#allocation3] sm:$0xff]  ;;  %v370_v5 = vld [vmem:[#allocation6] sm:$0xff]   ;;  %v371_v6 = vld [vmem:[#allocation6 + $0x8] sm:$0xff]   ;;  %v456_v23 = vmov 0   ;;  %vm285_vm2 = vcmask 57344  }
  0x2b   :  { %334 = vmatprep.subr.bf16.mxu1 %v454_v1  ;;  %350 = vmatprep.mubr.msk.bf16.mxu1 %vm455_vm0, %v454_v1  ;;  %v57_v4 = vpack.c.bf16 %v56_v3, %v56_v3  ;;  %v372_v7 = vld [vmem:[#allocation6 + $0x10] sm:$0xff]   ;;  %v373_v8 = vld [vmem:[#allocation6 + $0x18] sm:$0xff]   ;;  %v374_v9 = vld [vmem:[#allocation6 + $0x20] sm:$0xff]   ;;  %v242_v35 = vshrl.u32 %v241_v34, 7 }
  0x2c   :  { %329 = vmatpush3.bf16.msra.mxu0 %v369_v2  ;;  %335 = vmatpush3.bf16.msra.mxu1 %v370_v5  ;;  %v375_v10 = vld [vmem:[#allocation6 + $0x28] sm:$0xff]   ;;  %v376_v11 = vld [vmem:[#allocation6 + $0x30] sm:$0xff]   ;;  %v377_v12 = vld [vmem:[#allocation6 + $0x38] sm:$0xff]  }
  0x2d   :  { %354 = vmatprep.subr.bf16.mxu0 %v454_v1  ;;  %336 = vmatprep.subr.bf16.mxu1 %v454_v1  ;;  %v303_v13 = vld [vmem:[%s558_s2] ss:$0 sm:$0xff]  ;;  %v243_v36 = vsub.s32 0, %v242_v35 }
  0x2e   :  { %v235_v22 = vld [vmem:[#allocation2] sm:$0x1]  ;;  %368 = vset.pattern.permute.xlu0 %v456_v23 }
  0x2f   :  { %331 = vmatmul.mubr.msk.bf16.vlgmr.msra.gmra.mrb[0].mxu0 %vm73_vm1, %v57_v4  ;;  %238 = vperm.xlu0 %368, %v235_v22   ;;  %v306_v24 = vld [vmem:[%s560_s4] ss:$0 sm:$0xff]  ;;  %s457_s4 = smov [#allocation8]  }
  0x30   :  { %356 = vmatprep.mubr.msk.bf16.mxu0 %vm455_vm0, %v454_v1  ;;  %337 = vmatpush3.bf16.msra.mxu1 %v371_v6  ;;  %v234_v33 = vld [vmem:[%s561_s5] sm:$0x1]  ;;  %s293_s9 = sshll.u32 %s457_s4, 4  ;;  %s294_s9 = int_to_ptr.vmem [resolvable:$true] %s293_s9 }
  0x31   :  { %338 = vmatprep.subr.bf16.mxu1 %v454_v1  ;;  %s422_s10 = scalar_lea.vmem %s294_s9, 16  ;;  %s426_s11 = scalar_lea.vmem %s294_s9, 32 }
  0x32   :  { %p423_p2 = scmp.ne.s32.totalorder %s294_s9, %s422_s10  ;;  %p427_p3 = scmp.lt.s32.totalorder %s294_s9, %s294_s9 }
  0x33   :  { %p428_p4 = scmp.lt.s32.totalorder %s426_s11, %s422_s10 }
  0x34   :  { %339 = vmatpush3.bf16.msra.mxu1 %v372_v7 }
  0x35   :  { %340 = vmatprep.subr.bf16.mxu1 %v454_v1  ;;  %p429_p5 = por %p428_p4, %p427_p3 }
  0x37   :  { %p430_p6 = pnand %p429_p5, %p423_p2 }
  0x38   :  { %341 = vmatpush3.bf16.msra.mxu1 %v373_v8 }
  0x39   :  { %342 = vmatprep.subr.bf16.mxu1 %v454_v1 }
  0x3c   :  { %343 = vmatpush3.bf16.msra.mxu1 %v374_v9 }
  0x3d   :  { %344 = vmatprep.subr.bf16.mxu1 %v454_v1 }
  0x40   :  { %345 = vmatpush3.bf16.msra.mxu1 %v375_v10 }
  0x41   :  { %346 = vmatprep.subr.bf16.mxu1 %v454_v1 }
  0x44   :  { %347 = vmatpush3.bf16.msra.mxu1 %v376_v11 }
  0x45   :  { %348 = vmatprep.subr.bf16.mxu1 %v454_v1 }
  0x48   :  { %349 = vmatpush3.bf16.msra.mxu1 %v377_v12 }
  0xae   :  { %v239_v37 = vpop.permute.xlu0 %238 }
  0xaf   :  { %v244_v38 = vrot.slane %v239_v37, %v243_v36 }
 0x102   :  { %v111_v14 = vpop.f32.mrb[0].mxu0 }
 0x103   :  { %v112_v15 = vadd.f32 %v303_v13, %v111_v14  ;;  %v332_v16 = vpop.f32.mrb[1].mxu0 }
 0x104   :  { %v114_v17 = vpop.f32.mrb[2].mxu0 }
 0x105   :  { %v117_v18 = vmul.f32 0.01, %v112_v15  ;;  %v333_v19 = vpop.f32.mrb[3].mxu0 }
 0x107   :  { %v118_v20 = vmax.f32 %v112_v15, %v117_v18 }
 0x109   :  { %v119_v21 = vpack.c.bf16 %v118_v20, %v118_v20 }
 0x10b   :  { %351 = vmatmul.mubr.bf16.vlgmr.msra.gmra.mrb[0].mxu1 %v119_v21 }
 0x1de   :  { %v225_v25 = vpop.f32.mrb[0].mxu1 }
 0x1df   :  { %v226_v26 = vadd.f32 %v306_v24, %v225_v25  ;;  %v352_v27 = vpop.f32.mrb[1].mxu1 }
 0x1e0   :  { %v228_v28 = vpop.f32.mrb[2].mxu1 }
 0x1e1   :  { %v231_v29 = vmul.f32 0.01, %v226_v26  ;;  %v353_v30 = vpop.f32.mrb[3].mxu1 }
 0x1e3   :  { %v232_v31 = vmax.f32 %v226_v26, %v231_v29 }
 0x1e5   :  { %v233_v32 = vpack.c.bf16 %v232_v31, %v232_v31 }
 0x1e7   :  { %355 = vmatpush3.bf16.xpose.msra.mxu0 %v233_v32 }
 0x1ee   :  { %357 = vmatmul.mubr.bf16.vlgmr.msra.gmra.mrb[4].mxu0 %v234_v33 }
 0x2c1   :  { %v279_v39 = vpop.f32.mrb[4].mxu0 }
 0x2c2   :  { %v280_v40 = vadd.f32 %v279_v39, %v244_v38  ;;  %v358_v41 = vpop.f32.mrb[5].mxu0 }
 0x2c3   :  { %v282_v42 = vpop.f32.mrb[6].mxu0 }
 0x2c4   :  { %v359_v43 = vpop.f32.mrb[7].mxu0  ;;  %286 = vst.msk [vmem:[#allocation8] sm:$0x1] %vm285_vm2, %v280_v40 }
 0x2c5   :  { %433 = shalt.err (!%p430_p6)
}
 0x2c6   :  { %s434_s12 = scalar_lea.hbm %s563_s7, 16 }
 0x2c7   :  { %p435_p7 = scmp.ne.s32.totalorder %s563_s7, %s434_s12  ;;  %p438_p8 = scmp.lt.u32.totalorder %s434_s12, %s563_s7 }
 0x2c9   :  { %p440_p9 = pnand %p438_p8, %p435_p7 }
 0x2cb   :  { %443 = shalt.err (!%p440_p9)
}
 0x2cc   :  { %296 = dma.vmem_to_hbm [thread:$0]  %s294_s9, 16, %s563_s7, [#allocation5]  }
 0x2cd   :  { %448 = dma.done.wait [#allocation5], 16  }
 0x2ce   :  { %449 = vsyncadd [#allocation5], 4294967280 }
 0x2cf   :  { %300 = vsyncpa [#allocation4], 1 }
 0x2d0   :  { %301 = vsyncpa [#allocation7], 1 }
 0x2d1   :  { %302 = vsyncpa [#allocation5], 1 }

</bundles_post_ra>
